<compile_context>
chip_gen: v7x
topology: tpu7x:2x2x1
jax: 0.10.0
libtpu: 0.0.40
codegen_flags: <defaults>
</compile_context>

<pallas_src>
"""Pallas TPU kernel for the PyTorch PositionalEncoding module forward pass.

Computes out = x + pe[:seq_len] for seq-first x of shape (S, B, D); the
precomputed sin/cos buffer pe has shape (max_len, 1, D) and broadcasts over
the batch axis, exactly matching the reference nn.Module.

Design (bandwidth-bound broadcast-add):
  * Lane-dense output: x is viewed as (S, B*D) so stores are unmasked full
    vregs whenever B*D is a multiple of 128 (true for model_dim=512).
  * 1-D seq grid with BlockSpec pipelining; pe rows are selected by the
    index_map so no wrapper slice copies the buffer (tiny fallback slice only
    when required by the (8,128) tiling rule or max_len coverage).
  * Generation-aware tile sizing: ~8 MiB x-blocks on 128 MiB-VMEM parts
    (v5e/v6e), ~4 MiB blocks plus a >=4-step grid on 64 MiB-VMEM parts
    (v7x, 2 TensorCores), with vmem_limit_bytes sized to the actual
    double-buffered need instead of a blanket value.
  * Per-batch lane-slice adds instead of jnp.tile when D % 128 == 0: no
    (ts, B*D) temporary, pure VPU work, frees VMEM for larger tiles.
  * pe is cast to x.dtype once in the wrapper (halves pe HBM traffic when
    activations are bf16); kept as f32 for f32 inputs so results match the
    reference exactly.
"""

import functools
import math

import jax
import jax.numpy as jnp
from jax.experimental import pallas as pl
from jax.experimental.pallas import tpu as pltpu


def make_positional_encoding(model_dim: int, max_len: int = 5000) -> jnp.ndarray:
    """Deterministic buffer identical to the PyTorch __init__ (even model_dim)."""
    position = jnp.arange(0, max_len, dtype=jnp.float32)[:, None]          # (max_len, 1)
    div_term = jnp.exp(
        jnp.arange(0, model_dim, 2, dtype=jnp.float32)
        * (-math.log(10000.0) / model_dim)
    )                                                                      # (D/2,)
    enc = jnp.zeros((max_len, model_dim), dtype=jnp.float32)
    enc = enc.at[:, 0::2].set(jnp.sin(position * div_term))
    enc = enc.at[:, 1::2].set(jnp.cos(position * div_term))
    # unsqueeze(0).transpose(0, 1) -> (max_len, 1, model_dim)
    return enc[:, None, :]


def _add_pe_kernel(x_ref, pe_ref, o_ref, *, batch: int, d: int, slicewise: bool):
    # x_ref / o_ref: (ts, B*D) lane-dense blocks; pe_ref: (ts, D) block.
    pe = pe_ref[...]
    if slicewise:
        # D % 128 == 0: each batch slice is lane-tile aligned -> plain VPU adds
        # with no (ts, B*D) temporary (minimal VMEM/vreg pressure).
        for b in range(batch):
            sl = slice(b * d, (b + 1) * d)
            o_ref[:, sl] = (x_ref[:, sl] + pe).astype(o_ref.dtype)
    else:
        # Fallback for lane-misaligned D: broadcast pe over the folded batch.
        o_ref[...] = (x_ref[...] + jnp.tile(pe, (1, batch))).astype(o_ref.dtype)


def _tpu_vmem_capacity_bytes() -> int:
    """Best-effort VMEM capacity query; conservative fallback if unavailable."""
    try:
        info = pltpu.get_tpu_info()
        cap = int(getattr(info, "vmem_capacity_bytes", 0))
        if cap > 0:
            return cap
    except Exception:
        pass
    try:
        kind = jax.devices()[0].device_kind.lower()
    except Exception:
        kind = ""
    return (64 << 20) if "v7" in kind else (128 << 20)


def _pick_seq_tile(seq_len: int, row_bytes: int, sublane: int,
                   target_bytes: int, min_steps: int) -> int:
    """Largest seq tile whose x-block is ~target_bytes, rounded to the dtype's
    sublane multiple; optionally capped so the grid has >= min_steps steps."""
    ts = max(1, target_bytes // max(1, row_bytes))
    if min_steps > 1 and seq_len >= min_steps * sublane:
        ts = min(ts, -(-seq_len // min_steps))        # keep >= min_steps grid steps
    if ts >= seq_len:
        return seq_len
    ts = max(sublane, (ts // sublane) * sublane)
    return min(ts, seq_len)


def positional_encoding_forward(x: jnp.ndarray, pe_full: jnp.ndarray) -> jnp.ndarray:
    """x: (S, B, D); pe_full: (max_len, 1, D) with max_len >= S. Returns x + pe[:S]."""
    S, B, D = x.shape
    max_len = pe_full.shape[0]
    assert max_len >= S and pe_full.shape[2] == D

    # Fold batch into the lane axis (free metadata reshape on contiguous data).
    x2 = x.reshape(S, B * D)
    # Stream pe in x's dtype (halves pe HBM traffic for bf16 activations;
    # no-op for f32 so the f32 path matches the reference exactly).
    pe_flat = pe_full.reshape(max_len, D).astype(x.dtype)

    itemsize = x.dtype.itemsize
    sublane = max(8, 32 // max(1, itemsize))          # f32->8, bf16->16, int8/fp8->32

    vmem_cap = _tpu_vmem_capacity_bytes()
    small_vmem = vmem_cap <= (64 << 20)               # v7x-class: 64 MiB VMEM, 2 TCs
    target_bytes = (4 << 20) if small_vmem else (8 << 20)
    min_steps = 4 if small_vmem else 1

    ts = _pick_seq_tile(S, B * D * itemsize, sublane, target_bytes, min_steps)
    num_blocks = pl.cdiv(S, ts)

    # pe rows are selected by the index_map (no wrapper slice). Fall back to a
    # tiny slice only when tiling rules or max_len coverage require it.
    needs_slice = (ts % sublane != 0) or (num_blocks * ts > max_len)
    pe_in = pe_flat[:S] if needs_slice else pe_flat

    # VMEM: double-buffered x-in, out, and pe blocks, plus margin; clamped to a
    # generation-appropriate ceiling (v7x only has 64 MiB physical VMEM).
    x_block_bytes = ts * B * D * itemsize
    pe_block_bytes = ts * D * pe_in.dtype.itemsize
    vmem_need = 2 * (2 * x_block_bytes + pe_block_bytes) + (2 << 20)
    vmem_ceiling = (48 << 20) if small_vmem else (96 << 20)
    vmem_limit = int(min(max(vmem_need, 8 << 20), vmem_ceiling))

    kernel = functools.partial(
        _add_pe_kernel, batch=B, d=D, slicewise=(D % 128 == 0))

    # TODO(synk): optional further opt (v6e, small B): generate pe rows in-kernel
    # from iota + sin/cos to drop pe HBM traffic entirely; kept as a streamed
    # input here since the EUP-vs-DMA tradeoff needs a bundle-dump check.
    out2 = pl.pallas_call(
        kernel,
        out_shape=jax.ShapeDtypeStruct((S, B * D), x.dtype),
        grid_spec=pltpu.PrefetchScalarGridSpec(
            num_scalar_prefetch=0,
            grid=(num_blocks,),
            in_specs=[
                pl.BlockSpec((ts, B * D), lambda i: (i, 0)),   # x tiles
                pl.BlockSpec((ts, D), lambda i: (i, 0)),       # matching pe rows
            ],
            out_specs=pl.BlockSpec((ts, B * D), lambda i: (i, 0)),
        ),
        compiler_params=pltpu.CompilerParams(
            dimension_semantics=("parallel",),        # megacore-shardable seq axis
            vmem_limit_bytes=vmem_limit,
        ),
    )(x2, pe_in)

    return out2.reshape(S, B, D)


if __name__ == "__main__":
    key = jax.random.PRNGKey(0)

    # Small shapes consistent with the module (seq-first x, model_dim=512).
    seq_len, batch, model_dim, max_len = 8, 2, 512, 64
    x = jax.random.normal(key, (seq_len, batch, model_dim), dtype=jnp.float32)
    pe_small = make_positional_encoding(model_dim, max_len)

    out = jax.block_until_ready(positional_encoding_forward(x, pe_small))
    ref = x + pe_small[:seq_len]
    assert out.shape == x.shape and out.dtype == x.dtype
    assert jnp.allclose(out, ref, atol=1e-6), "mismatch vs reference (small case)"

    # Larger case exercising the multi-step (tiled / pipelined) grid path with
    # the module's default max_len.
    seq_len2, max_len2 = 4096, 5000
    x2 = jax.random.normal(jax.random.PRNGKey(0),
                           (seq_len2, batch, model_dim), dtype=jnp.float32)
    pe_big = make_positional_encoding(model_dim, max_len2)

    out2 = jax.block_until_ready(positional_encoding_forward(x2, pe_big))
    ref2 = x2 + pe_big[:seq_len2]
    assert out2.shape == x2.shape and out2.dtype == x2.dtype
    assert jnp.allclose(out2, ref2, atol=1e-6), "mismatch vs reference (tiled case)"

    print("KERNEL_OK")
</pallas_src>

<mosaic_0001>
module attributes {stable_mosaic.version = 11 : i64} {
  func.func @_add_pe_kernel(%arg0: i32, %arg1: memref<8x1024xf32, #tpu.memory_space<vmem>>, %arg2: memref<8x512xf32, #tpu.memory_space<vmem>>, %arg3: memref<8x1024xf32, #tpu.memory_space<vmem>>) attributes {dimension_semantics = [#tpu.dimension_semantics<parallel>], iteration_bounds = array<i64: 1>, scalar_prefetch = 0 : i64, scratch_operands = 0 : i64, tpu.core_type = #tpu.core_type<tc>, window_params = [{transform_indices = @transform_0, window_bounds = array<i64: 8, 1024>}, {transform_indices = @transform_1, window_bounds = array<i64: 8, 512>}, {transform_indices = @transform_2, window_bounds = array<i64: 8, 1024>}]} {
    %c0 = arith.constant 0 : index
    %c0_0 = arith.constant 0 : index
    %0 = vector.load %arg2[%c0, %c0_0] : memref<8x512xf32, #tpu.memory_space<vmem>>, vector<8x512xf32>
    %c0_1 = arith.constant 0 : index
    %c0_2 = arith.constant 0 : index
    %1 = vector.load %arg1[%c0_1, %c0_2] : memref<8x1024xf32, #tpu.memory_space<vmem>>, vector<8x512xf32>
    %2 = arith.addf %1, %0 : vector<8x512xf32>
    %c0_3 = arith.constant 0 : index
    %c0_4 = arith.constant 0 : index
    %3 = vector.load %arg3[%c0_3, %c0_4] : memref<8x1024xf32, #tpu.memory_space<vmem>>, vector<8x512xf32>
    tpu.vector_store %arg3[%c0_3, %c0_4], %2 {strides = array<i32>} : memref<8x1024xf32, #tpu.memory_space<vmem>>, vector<8x512xf32>,
    %c0_5 = arith.constant 0 : index
    %c512 = arith.constant 512 : index
    %4 = vector.load %arg1[%c0_5, %c512] : memref<8x1024xf32, #tpu.memory_space<vmem>>, vector<8x512xf32>
    %5 = arith.addf %4, %0 : vector<8x512xf32>
    %c0_6 = arith.constant 0 : index
    %c512_7 = arith.constant 512 : index
    %6 = vector.load %arg3[%c0_6, %c512_7] : memref<8x1024xf32, #tpu.memory_space<vmem>>, vector<8x512xf32>
    tpu.vector_store %arg3[%c0_6, %c512_7], %5 {strides = array<i32>} : memref<8x1024xf32, #tpu.memory_space<vmem>>, vector<8x512xf32>,
    return
  }
  func.func @transform_0(%arg0: i32) -> (i32, i32) {
    %c0_i32 = arith.constant 0 : i32
    %c0_i32_0 = arith.constant 0 : i32
    return %arg0, %c0_i32 : i32, i32
  }
  func.func @transform_1(%arg0: i32) -> (i32, i32) {
    %c0_i32 = arith.constant 0 : i32
    %c0_i32_0 = arith.constant 0 : i32
    return %arg0, %c0_i32 : i32, i32
  }
  func.func @transform_2(%arg0: i32) -> (i32, i32) {
    %c0_i32 = arith.constant 0 : i32
    %c0_i32_0 = arith.constant 0 : i32
    return %arg0, %c0_i32 : i32, i32
  }
}

</mosaic_0001>

<bundles_post_ra>
// kernel: tpu_custom_call.1
= control target key start
LH: loop header
LB: loop body
LE: loop exit
PB: predicated region body
PF: predicated region fallthrough
CT: control target
= control target key end

     0   :  { %7 = vsyncpa [#allocation3], 0  ;;  %s219_s0 = inlined_call_operand.hbm [shape: f32[8,1024], index: 0, kind: input, shape index: {}]   ;;  %s220_s1 = inlined_call_operand.hbm [shape: f32[64,512], index: 1, kind: input, shape index: {}]   ;;  %s221_s2 = inlined_call_operand.hbm [shape: f32[8,1024], index: 2, kind: output, shape index: {}]  }
   0x1   :  { %8 = vsyncpa [#allocation6], 0 }
   0x2   :  { %9 = vsyncpa [#allocation4], 0  ;;  %s155_s9 = smov [#allocation2]   ;;  %s156_s11 = smov [#allocation5]  }
   0x3   :  { %s16_s10 = sshll.u32 %s155_s9, 4  ;;  %s26_s12 = sshll.u32 %s156_s11, 4  ;;  %s17_s10 = int_to_ptr.vmem [resolvable:$true] %s16_s10  ;;  %s173_s12 = int_to_ptr.vmem [resolvable:$true] %s26_s12 }
   0x4   :  { %s83_s15 = scalar_lea.hbm %s219_s0, 1024 }
   0x5   :  { %p84_p0 = scmp.ne.s32.totalorder %s219_s0, %s83_s15  ;;  %p87_p1 = scmp.lt.u32.totalorder %s83_s15, %s219_s0 }
   0x7   :  { %p89_p2 = pnand %p87_p1, %p84_p0 }
   0x9   :  { %92 = shalt.err (!%p89_p2)
}
   0xa   :  { %s93_s20 = scalar_lea.vmem %s17_s10, 1024  ;;  %p98_p4 = scmp.lt.s32.totalorder %s17_s10, %s17_s10 }
   0xb   :  { %p94_p3 = scmp.ne.s32.totalorder %s17_s10, %s93_s20  ;;  %p99_p5 = scmp.lt.s32.totalorder %s93_s20, %s93_s20 }
   0xd   :  { %p100_p6 = por %p99_p5, %p98_p4 }
   0xf   :  { %p101_p7 = pnand %p100_p6, %p94_p3 }
  0x11   :  { %104 = shalt.err (!%p101_p7)
}
  0x12   :  { %19 = dma.hbm_to_vmem [thread:$0]  %s219_s0, 1024, %s17_s10, [#allocation3]  }
  0x13   :  { %s105_s25 = scalar_lea.hbm %s220_s1, 512  ;;  %s107_s30 = scalar_lea.hbm %s220_s1, 4096 }
  0x14   :  { %p106_p8 = scmp.ne.s32.totalorder %s220_s1, %s105_s25  ;;  %p108_p9 = scmp.lt.u32.totalorder %s107_s30, %s105_s25 }
  0x15   :  { %p109_p10 = scmp.lt.u32.totalorder %s105_s25, %s220_s1 }
  0x17   :  { %p110_p11 = por %p109_p10, %p108_p9 }
  0x19   :  { %p111_p12 = pnand %p110_p11, %p106_p8 }
  0x1b   :  { %114 = shalt.err (!%p111_p12)
}
  0x1c   :  { %s115_s0 = scalar_lea.vmem %s173_s12, 512  ;;  %p120_p0 = scmp.lt.s32.totalorder %s173_s12, %s173_s12 }
  0x1d   :  { %p116_p13 = scmp.ne.s32.totalorder %s173_s12, %s115_s0  ;;  %p121_p1 = scmp.lt.s32.totalorder %s115_s0, %s115_s0 }
  0x1f   :  { %p122_p2 = por %p121_p1, %p120_p0 }
  0x21   :  { %p123_p3 = pnand %p122_p2, %p116_p13 }
  0x23   :  { %126 = shalt.err (!%p123_p3)
}
  0x24   :  { %29 = dma.hbm_to_vmem [thread:$0]  %s220_s1, 512, %s173_s12, [#allocation6]  }
  0x25   :  { %149 = dma.done.wait [#allocation3], 1024  }
  0x26   :  { %150 = vsyncadd [#allocation3], 4294966272 }
  0x27   :  { %151 = dma.done.wait [#allocation6], 512  }
  0x28   :  { %152 = vsyncadd [#allocation6], 4294966784  ;;  %v36_v0 = vld [vmem:[#allocation5] sm:$0xff]  ;;  %v37_v2 = vld [vmem:[#allocation5 + $0x8] sm:$0xff]  ;;  %s157_s7 = smov [#allocation7]  }
  0x29   :  { %v40_v1 = vld [vmem:[#allocation2] sm:$0xff]  ;;  %v41_v4 = vld [vmem:[#allocation2 + $0x8] sm:$0xff]  ;;  %v38_v5 = vld [vmem:[#allocation5 + $0x10] sm:$0xff]  ;;  %s70_s8 = sshll.u32 %s157_s7, 4  ;;  %s71_s8 = int_to_ptr.vmem [resolvable:$true] %s70_s8 }
  0x2a   :  { %v44_v3 = vadd.f32 %v40_v1, %v36_v0  ;;  %v42_v6 = vld [vmem:[#allocation2 + $0x10] sm:$0xff]  ;;  %v45_v7 = vadd.f32 %v41_v4, %v37_v2  ;;  %v39_v9 = vld [vmem:[#allocation5 + $0x18] sm:$0xff]  ;;  %v52_v11 = vld [vmem:[#allocation2 + $0x20] sm:$0xff]  ;;  %s127_s1 = scalar_lea.vmem %s71_s8, 1024  ;;  %p132_p5 = scmp.lt.s32.totalorder %s71_s8, %s71_s8 }
  0x2b   :  { %v46_v8 = vadd.f32 %v42_v6, %v38_v5  ;;  %v43_v10 = vld [vmem:[#allocation2 + $0x18] sm:$0xff]  ;;  %v56_v13 = vadd.f32 %v52_v11, %v36_v0  ;;  %v53_v14 = vld [vmem:[#allocation2 + $0x28] sm:$0xff]  ;;  %v54_v15 = vld [vmem:[#allocation2 + $0x30] sm:$0xff]  ;;  %p128_p4 = scmp.ne.s32.totalorder %s71_s8, %s127_s1  ;;  %p133_p6 = scmp.lt.s32.totalorder %s127_s1, %s127_s1 }
  0x2c   :  { %48 = vst [vmem:[#allocation7] sm:$0xff] %v44_v3  ;;  %v47_v12 = vadd.f32 %v43_v10, %v39_v9  ;;  %v55_v16 = vld [vmem:[#allocation2 + $0x38] sm:$0xff]  ;;  %49 = vst [vmem:[#allocation7 + $0x8] sm:$0xff] %v45_v7  ;;  %v57_v17 = vadd.f32 %v53_v14, %v37_v2  ;;  %v58_v18 = vadd.f32 %v54_v15, %v38_v5 }
  0x2d   :  { %50 = vst [vmem:[#allocation7 + $0x10] sm:$0xff] %v46_v8  ;;  %v59_v19 = vadd.f32 %v55_v16, %v39_v9  ;;  %60 = vst [vmem:[#allocation7 + $0x20] sm:$0xff] %v56_v13  ;;  %p134_p7 = por %p133_p6, %p132_p5 }
  0x2e   :  { %51 = vst [vmem:[#allocation7 + $0x18] sm:$0xff] %v47_v12  ;;  %61 = vst [vmem:[#allocation7 + $0x28] sm:$0xff] %v57_v17 }
  0x2f   :  { %62 = vst [vmem:[#allocation7 + $0x30] sm:$0xff] %v58_v18  ;;  %63 = vst [vmem:[#allocation7 + $0x38] sm:$0xff] %v59_v19  ;;  %p135_p8 = pnand %p134_p7, %p128_p4 }
  0x31   :  { %138 = shalt.err (!%p135_p8)
}
  0x32   :  { %s139_s11 = scalar_lea.hbm %s221_s2, 1024 }
  0x33   :  { %p140_p9 = scmp.ne.s32.totalorder %s221_s2, %s139_s11  ;;  %p143_p10 = scmp.lt.u32.totalorder %s139_s11, %s221_s2 }
  0x35   :  { %p145_p11 = pnand %p143_p10, %p140_p9 }
  0x37   :  { %148 = shalt.err (!%p145_p11)
}
  0x38   :  { %73 = dma.vmem_to_hbm [thread:$0]  %s71_s8, 1024, %s221_s2, [#allocation4]  }
  0x39   :  { %153 = dma.done.wait [#allocation4], 1024  }
  0x3a   :  { %154 = vsyncadd [#allocation4], 4294966272 }
  0x3b   :  { %77 = vsyncpa [#allocation3], 1 }
  0x3c   :  { %78 = vsyncpa [#allocation6], 1 }
  0x3d   :  { %79 = vsyncpa [#allocation4], 1 }

</bundles_post_ra>
